<compile_context>
chip_gen: v6e
topology: v6e:2x2x1
jax: 0.10.0
libtpu: 0.0.40
codegen_flags: <defaults>
</compile_context>

<pallas_src>
import jax
import jax.numpy as jnp
from jax.experimental import pallas as pl
from jax.experimental.pallas import tpu as pltpu


def _attention_gate_kernel(g_ref, s_ref,
                           wgT_ref, wsT_ref, woT_ref,
                           bgs_ref, bo_ref,
                           out_ref):
    # g_ref: (1, Cg, TS), s_ref: (1, Cs, TS)  — channels on sublanes, spatial on lanes
    # wgT: (Co, Cg), wsT: (Co, Cs), woT: (Co, Co)
    # bgs: (Co, 1) = folded bg_eff + bs_eff,  bo: (Co, 1)
    gb = g_ref[0].astype(jnp.float32)            # (Cg, TS)
    sb = s_ref[0].astype(jnp.float32)            # (Cs, TS)

    # relu( BN(Conv1x1(g)) + BN(Conv1x1(s)) )   (BN folded into weights/bias)
    h = (jnp.dot(wgT_ref[...], gb, preferred_element_type=jnp.float32)
         + jnp.dot(wsT_ref[...], sb, preferred_element_type=jnp.float32)
         + bgs_ref[...])
    h = jnp.maximum(h, 0.0)

    # sigmoid( Conv1x1(h) )
    attn = jax.nn.sigmoid(
        jnp.dot(woT_ref[...], h, preferred_element_type=jnp.float32) + bo_ref[...])

    # gate * s  — (Co, TS) lane-dense store
    out_ref[0] = (attn * sb).astype(out_ref.dtype)


def _pick_spatial_tile(hw, max_tile=2048):
    """Largest lane-dense tile (multiple of 128) dividing hw; else full extent."""
    if hw <= max_tile or hw % 128 != 0:
        return hw
    for ts in (2048, 1024, 512, 384, 256, 128):
        if ts <= max_tile and hw % ts == 0:
            return ts
    return hw


def attention_gate_pallas(g, s, params, *, max_spatial_tile=2048):
    """g: (N, Cg, H, W), s: (N, Cs, H, W), NCHW.

    params: dict with eval-mode-BN-folded weights:
      wg_eff (Cg, Co), bg_eff (Co,), ws_eff (Cs, Co), bs_eff (Co,),
      wo (Co, Co), bo (Co,)
    Returns (N, Cs, H, W) NCHW, dtype = s.dtype (result is a gated s).
    """
    N, Cg, H, W = g.shape
    _, Cs, _, _ = s.shape
    Co = params["wg_eff"].shape[1]
    assert Co == Cs, "out_c must equal in_c[1] for `out * s` elementwise gating"

    HW = H * W
    TS = _pick_spatial_tile(HW, max_spatial_tile)
    assert HW % TS == 0
    n_sp = HW // TS

    # Free reshapes: NCHW stays NCHW, spatial flattened onto the lane axis.
    g3 = g.reshape(N, Cg, HW)
    s3 = s.reshape(N, Cs, HW)

    # Weights transposed so each 1x1 conv is W^T @ X; branch biases combined.
    wgT = params["wg_eff"].T.astype(jnp.float32)                      # (Co, Cg)
    wsT = params["ws_eff"].T.astype(jnp.float32)                      # (Co, Cs)
    woT = params["wo"].T.astype(jnp.float32)                          # (Co, Co)
    bgs = (params["bg_eff"] + params["bs_eff"]).reshape(Co, 1).astype(jnp.float32)
    bo = params["bo"].reshape(Co, 1).astype(jnp.float32)

    out_dtype = s.dtype
    grid = (N, n_sp)

    act_spec = lambda c: pl.BlockSpec((1, c, TS), lambda n, j: (n, 0, j))
    full = lambda shape: pl.BlockSpec(shape, lambda n, j: (0, 0))

    # Advisory cost estimate so XLA can overlap this call with neighbours.
    rows = N * HW
    bytes_accessed = int(
        g3.size * g3.dtype.itemsize + s3.size * s3.dtype.itemsize
        + rows * Co * jnp.dtype(out_dtype).itemsize
        + (wgT.size + wsT.size + woT.size + bgs.size + bo.size) * 4)
    cost = pl.CostEstimate(
        flops=2 * rows * (Cg + Cs + Co) * Co,
        transcendentals=rows * Co,
        bytes_accessed=bytes_accessed)

    # VMEM budget: double-buffered g/s/out tiles + small resident weights,
    # with generous headroom; clamp to 48 MiB so it fits v7x's 64 MiB physical
    # VMEM and is well under v5e/v6e's 128 MiB.
    pad8 = lambda c: ((c + 7) // 8) * 8
    tile_bytes = (pad8(Cg) + pad8(Cs) + pad8(Co)) * TS * 4
    vmem_limit = int(min(max(6 * tile_bytes + (2 << 20), 8 << 20), 48 << 20))

    out3 = pl.pallas_call(
        _attention_gate_kernel,
        out_shape=jax.ShapeDtypeStruct((N, Co, HW), out_dtype),
        grid_spec=pltpu.PrefetchScalarGridSpec(
            num_scalar_prefetch=0,
            grid=grid,
            in_specs=[
                act_spec(Cg),        # g block   (1, Cg, TS)
                act_spec(Cs),        # s block   (1, Cs, TS)
                full((Co, Cg)),      # wgT
                full((Co, Cs)),      # wsT
                full((Co, Co)),      # woT
                full((Co, 1)),       # combined bias bg_eff + bs_eff
                full((Co, 1)),       # bo
            ],
            out_specs=pl.BlockSpec((1, Co, TS), lambda n, j: (n, 0, j)),
        ),
        compiler_params=pltpu.CompilerParams(
            dimension_semantics=("parallel", "parallel"),
            vmem_limit_bytes=vmem_limit),
        cost_estimate=cost,
    )(g3, s3, wgT, wsT, woT, bgs, bo)

    return out3.reshape(N, Co, H, W)


def make_params(key, in_c, out_c):
    """Deterministic synthetic parameters mirroring the PyTorch module's __init__
    shapes, with BatchNorm (inference mode) folded into the 1x1 convs."""
    ks = jax.random.split(key, 12)
    cg, cs = in_c

    def conv1x1(k, cin, cout):
        # PyTorch conv weight is (cout, cin, 1, 1); keep as (cin, cout) for matmul.
        w = jax.random.normal(ks[k], (cin, cout), jnp.float32) * 0.1
        b = jax.random.normal(ks[k + 1], (cout,), jnp.float32) * 0.1
        return w, b

    def bn(k, c):
        gamma = 1.0 + 0.1 * jax.random.normal(ks[k], (c,), jnp.float32)
        beta = 0.1 * jax.random.normal(ks[k + 1], (c,), jnp.float32)
        mean = 0.1 * jax.random.normal(ks[k + 2], (c,), jnp.float32)
        var = jnp.abs(jax.random.normal(ks[k + 3], (c,), jnp.float32)) + 0.5
        return gamma, beta, mean, var

    eps = 1e-5

    def fold(w, b, gamma, beta, mean, var):
        scale = gamma / jnp.sqrt(var + eps)          # (cout,)
        w_eff = w * scale[None, :]
        b_eff = (b - mean) * scale + beta
        return w_eff, b_eff

    wg_raw, bg_raw = conv1x1(0, cg, out_c)
    g_bn = bn(2, out_c)
    ws_raw, bs_raw = conv1x1(6, cs, out_c)
    s_bn = bn(8, out_c)
    wo, bo = conv1x1(4, out_c, out_c)

    wg_eff, bg_eff = fold(wg_raw, bg_raw, *g_bn)
    ws_eff, bs_eff = fold(ws_raw, bs_raw, *s_bn)

    return {
        "wg_eff": wg_eff, "bg_eff": bg_eff,
        "ws_eff": ws_eff, "bs_eff": bs_eff,
        "wo": wo, "bo": bo,
    }


def attention_gate_ref(g, s, params):
    """Pure-JAX reference (same folded-BN semantics) for sanity checking."""
    g2 = jnp.transpose(g, (0, 2, 3, 1))
    s2 = jnp.transpose(s, (0, 2, 3, 1))
    wg = g2 @ params["wg_eff"] + params["bg_eff"]
    ws = s2 @ params["ws_eff"] + params["bs_eff"]
    h = jax.nn.relu(wg + ws)
    a = jax.nn.sigmoid(h @ params["wo"] + params["bo"])
    out = a * s2
    return jnp.transpose(out, (0, 3, 1, 2))


if __name__ == "__main__":
    key = jax.random.PRNGKey(0)
    k_g, k_s, k_p = jax.random.split(key, 3)

    # small shapes: batch=2, in_c=(4,4), out_c=4, spatial=16x16
    in_c = (4, 4)
    out_c = 4
    N, H, W = 2, 16, 16

    g = jax.random.normal(k_g, (N, in_c[0], H, W), jnp.float32)
    s = jax.random.normal(k_s, (N, in_c[1], H, W), jnp.float32)
    params = make_params(k_p, in_c, out_c)

    # f32 path: exact check against the pure-JAX reference.
    out = jax.block_until_ready(attention_gate_pallas(g, s, params))
    ref = attention_gate_ref(g, s, params)
    assert out.shape == (N, in_c[1], H, W)
    assert out.dtype == s.dtype
    assert jnp.allclose(out, ref, atol=1e-5, rtol=1e-5), "mismatch vs JAX reference"

    # bf16 I/O path (halves HBM traffic on v6e/v7x); compute stays in f32.
    out_bf16 = jax.block_until_ready(
        attention_gate_pallas(g.astype(jnp.bfloat16), s.astype(jnp.bfloat16), params))
    assert out_bf16.shape == (N, in_c[1], H, W)
    assert out_bf16.dtype == jnp.bfloat16
    assert bool(jnp.all(jnp.isfinite(out_bf16.astype(jnp.float32))))

    print("KERNEL_OK")
</pallas_src>

<mosaic_0001>
module attributes {stable_mosaic.version = 11 : i64} {
  func.func @_attention_gate_kernel(%arg0: i32, %arg1: i32, %arg2: memref<1x4x256xf32, #tpu.memory_space<vmem>>, %arg3: memref<1x4x256xf32, #tpu.memory_space<vmem>>, %arg4: memref<4x4xf32, #tpu.memory_space<vmem>>, %arg5: memref<4x4xf32, #tpu.memory_space<vmem>>, %arg6: memref<4x4xf32, #tpu.memory_space<vmem>>, %arg7: memref<4x1xf32, #tpu.memory_space<vmem>>, %arg8: memref<4x1xf32, #tpu.memory_space<vmem>>, %arg9: memref<1x4x256xf32, #tpu.memory_space<vmem>>) attributes {dimension_semantics = [#tpu.dimension_semantics<parallel>, #tpu.dimension_semantics<parallel>], iteration_bounds = array<i64: 2, 1>, scalar_prefetch = 0 : i64, scratch_operands = 0 : i64, tpu.core_type = #tpu.core_type<tc>, window_params = [{transform_indices = @transform_0, window_bounds = array<i64: 1, 4, 256>}, {transform_indices = @transform_1, window_bounds = array<i64: 1, 4, 256>}, {pipeline_mode = #tpu.pipeline_mode<synchronous>, transform_indices = @transform_2, window_bounds = array<i64: 4, 4>}, {pipeline_mode = #tpu.pipeline_mode<synchronous>, transform_indices = @transform_3, window_bounds = array<i64: 4, 4>}, {pipeline_mode = #tpu.pipeline_mode<synchronous>, transform_indices = @transform_4, window_bounds = array<i64: 4, 4>}, {pipeline_mode = #tpu.pipeline_mode<synchronous>, transform_indices = @transform_5, window_bounds = array<i64: 4, 1>}, {pipeline_mode = #tpu.pipeline_mode<synchronous>, transform_indices = @transform_6, window_bounds = array<i64: 4, 1>}, {transform_indices = @transform_7, window_bounds = array<i64: 1, 4, 256>}]} {
    %c0 = arith.constant 0 : index
    %c0_0 = arith.constant 0 : index
    %c0_1 = arith.constant 0 : index
    %0 = vector.load %arg2[%c0, %c0_0, %c0_1] : memref<1x4x256xf32, #tpu.memory_space<vmem>>, vector<1x4x256xf32>
    %1 = vector.shape_cast %0 : vector<1x4x256xf32> to vector<4x256xf32>
    %c0_2 = arith.constant 0 : index
    %c0_3 = arith.constant 0 : index
    %c0_4 = arith.constant 0 : index
    %2 = vector.load %arg3[%c0_2, %c0_3, %c0_4] : memref<1x4x256xf32, #tpu.memory_space<vmem>>, vector<1x4x256xf32>
    %3 = vector.shape_cast %2 : vector<1x4x256xf32> to vector<4x256xf32>
    %c0_5 = arith.constant 0 : index
    %c0_6 = arith.constant 0 : index
    %4 = vector.load %arg4[%c0_5, %c0_6] : memref<4x4xf32, #tpu.memory_space<vmem>>, vector<4x4xf32>
    %cst = arith.constant dense<0.000000e+00> : vector<4x256xf32>
    %5 = tpu.matmul %4, %1, %cst {dimension_numbers = #tpu.dot_dimension_numbers<[1], [0], [0], [1], [0, 0, 1, 1], [], []>} : vector<4x4xf32>, vector<4x256xf32>, vector<4x256xf32> -> vector<4x256xf32>
    %c0_7 = arith.constant 0 : index
    %c0_8 = arith.constant 0 : index
    %6 = vector.load %arg5[%c0_7, %c0_8] : memref<4x4xf32, #tpu.memory_space<vmem>>, vector<4x4xf32>
    %cst_9 = arith.constant dense<0.000000e+00> : vector<4x256xf32>
    %7 = tpu.matmul %6, %3, %cst_9 {dimension_numbers = #tpu.dot_dimension_numbers<[1], [0], [0], [1], [0, 0, 1, 1], [], []>} : vector<4x4xf32>, vector<4x256xf32>, vector<4x256xf32> -> vector<4x256xf32>
    %8 = arith.addf %5, %7 : vector<4x256xf32>
    %c0_10 = arith.constant 0 : index
    %c0_11 = arith.constant 0 : index
    %9 = vector.load %arg7[%c0_10, %c0_11] : memref<4x1xf32, #tpu.memory_space<vmem>>, vector<4x1xf32>
    %10 = vector.broadcast %9 : vector<4x1xf32> to vector<4x256xf32>
    %11 = arith.addf %8, %10 : vector<4x256xf32>
    %cst_12 = arith.constant 0.000000e+00 : f32
    %12 = vector.broadcast %cst_12 : f32 to vector<4x256xf32>
    %13 = arith.maximumf %11, %12 : vector<4x256xf32>
    %c0_13 = arith.constant 0 : index
    %c0_14 = arith.constant 0 : index
    %14 = vector.load %arg6[%c0_13, %c0_14] : memref<4x4xf32, #tpu.memory_space<vmem>>, vector<4x4xf32>
    %cst_15 = arith.constant dense<0.000000e+00> : vector<4x256xf32>
    %15 = tpu.matmul %14, %13, %cst_15 {dimension_numbers = #tpu.dot_dimension_numbers<[1], [0], [0], [1], [0, 0, 1, 1], [], []>} : vector<4x4xf32>, vector<4x256xf32>, vector<4x256xf32> -> vector<4x256xf32>
    %c0_16 = arith.constant 0 : index
    %c0_17 = arith.constant 0 : index
    %16 = vector.load %arg8[%c0_16, %c0_17] : memref<4x1xf32, #tpu.memory_space<vmem>>, vector<4x1xf32>
    %17 = vector.broadcast %16 : vector<4x1xf32> to vector<4x256xf32>
    %18 = arith.addf %15, %17 : vector<4x256xf32>
    %19 = arith.negf %18 : vector<4x256xf32>
    %20 = math.exp %19 : vector<4x256xf32>
    %cst_18 = arith.constant 1.000000e+00 : f32
    %21 = vector.broadcast %cst_18 : f32 to vector<4x256xf32>
    %22 = arith.addf %21, %20 : vector<4x256xf32>
    %23 = arith.divf %21, %22 : vector<4x256xf32>
    %24 = arith.mulf %23, %3 : vector<4x256xf32>
    %c0_19 = arith.constant 0 : index
    %c0_20 = arith.constant 0 : index
    %c0_21 = arith.constant 0 : index
    %25 = vector.load %arg9[%c0_19, %c0_20, %c0_21] : memref<1x4x256xf32, #tpu.memory_space<vmem>>, vector<1x4x256xf32>
    %26 = vector.shape_cast %25 : vector<1x4x256xf32> to vector<4x256xf32>
    %27 = vector.shape_cast %24 : vector<4x256xf32> to vector<1x4x256xf32>
    tpu.vector_store %arg9[%c0_19, %c0_20, %c0_21], %27 {strides = array<i32>} : memref<1x4x256xf32, #tpu.memory_space<vmem>>, vector<1x4x256xf32>,
    return
  }
  func.func @transform_0(%arg0: i32, %arg1: i32) -> (i32, i32, i32) {
    %c0_i32 = arith.constant 0 : i32
    %c0_i32_0 = arith.constant 0 : i32
    return %arg0, %c0_i32, %arg1 : i32, i32, i32
  }
  func.func @transform_1(%arg0: i32, %arg1: i32) -> (i32, i32, i32) {
    %c0_i32 = arith.constant 0 : i32
    %c0_i32_0 = arith.constant 0 : i32
    return %arg0, %c0_i32, %arg1 : i32, i32, i32
  }
  func.func @transform_2(%arg0: i32, %arg1: i32) -> (i32, i32) {
    %c0_i32 = arith.constant 0 : i32
    %c0_i32_0 = arith.constant 0 : i32
    %c0_i32_1 = arith.constant 0 : i32
    return %c0_i32, %c0_i32_0 : i32, i32
  }
  func.func @transform_3(%arg0: i32, %arg1: i32) -> (i32, i32) {
    %c0_i32 = arith.constant 0 : i32
    %c0_i32_0 = arith.constant 0 : i32
    %c0_i32_1 = arith.constant 0 : i32
    return %c0_i32, %c0_i32_0 : i32, i32
  }
  func.func @transform_4(%arg0: i32, %arg1: i32) -> (i32, i32) {
    %c0_i32 = arith.constant 0 : i32
    %c0_i32_0 = arith.constant 0 : i32
    %c0_i32_1 = arith.constant 0 : i32
    return %c0_i32, %c0_i32_0 : i32, i32
  }
  func.func @transform_5(%arg0: i32, %arg1: i32) -> (i32, i32) {
    %c0_i32 = arith.constant 0 : i32
    %c0_i32_0 = arith.constant 0 : i32
    %c0_i32_1 = arith.constant 0 : i32
    return %c0_i32, %c0_i32_0 : i32, i32
  }
  func.func @transform_6(%arg0: i32, %arg1: i32) -> (i32, i32) {
    %c0_i32 = arith.constant 0 : i32
    %c0_i32_0 = arith.constant 0 : i32
    %c0_i32_1 = arith.constant 0 : i32
    return %c0_i32, %c0_i32_0 : i32, i32
  }
  func.func @transform_7(%arg0: i32, %arg1: i32) -> (i32, i32, i32) {
    %c0_i32 = arith.constant 0 : i32
    %c0_i32_0 = arith.constant 0 : i32
    return %arg0, %c0_i32, %arg1 : i32, i32, i32
  }
}

</mosaic_0001>

<bundles_post_ra>
// kernel: tpu_custom_call.1
= control target key start
LH: loop header
LB: loop body
LE: loop exit
PB: predicated region body
PF: predicated region fallthrough
CT: control target
= control target key end

     0   :  { %s1258_s0 = inlined_call_operand.hbm [shape: f32[2,4,256], index: 0, kind: input, shape index: {}]   ;;  %s1259_s1 = inlined_call_operand.hbm [shape: f32[2,4,256], index: 1, kind: input, shape index: {}]   ;;  %s1260_s2 = inlined_call_operand.vmem [shape: f32[4,4], index: 2, kind: input, shape index: {}]   ;;  %s1261_s3 = inlined_call_operand.vmem [shape: f32[4,4], index: 3, kind: input, shape index: {}]   ;;  %s1262_s4 = inlined_call_operand.vmem [shape: f32[4,4], index: 4, kind: input, shape index: {}]   ;;  %s1263_s5 = inlined_call_operand.vmem [shape: f32[4,1], index: 5, kind: input, shape index: {}]   ;;  %s1264_s6 = inlined_call_operand.vmem [shape: f32[4,1], index: 6, kind: input, shape index: {}]   ;;  %s1265_s7 = inlined_call_operand.hbm [shape: f32[2,4,256], index: 7, kind: output, shape index: {}]  }
   0x1   :  { %1268 = sst [smem:[#allocation13_spill]] %s1258_s0 }
   0x2   :  { %12 = vsyncpa [#allocation3], 0 }
   0x3   :  { %14 = vsyncpa [#allocation3 + $0x1], 0 }
   0x4   :  { %15 = vsyncpa [#allocation6], 0 }
   0x5   :  { %17 = vsyncpa [#allocation6 + $0x1], 0 }
   0x6   :  { %18 = vsyncpa [#allocation4], 0 }
   0x7   :  { %20 = vsyncpa [#allocation4 + $0x1], 0  ;;  %s1068_s24 = smov 0   ;;  %s1070_s25 = smov 0  }
   0x8   :  { %s1072_s26 = smov 0   ;;  %s1074_s27 = smov 0  }
   0x9   :  { %s1076_s28 = smov 0   ;;  %s1078_s29 = smov 0  }
   0xa LB: > { %1269 = sst [smem:[#allocation11_spill]] %s1017_s28  ;;  %s768_s30 = sadd.s32 4294967295, %s1021_s29   ;;  %s1021_s29 = sphi %s1078_s29, %s26_s29   ;;  %s1017_s28 = sphi %s1076_s28, %s1280_s28   ;;  %s1013_s27 = sphi %s1074_s27, %s1279_s27   ;;  %s1009_s26 = sphi %s1072_s26, %s1283_s26   ;;  %s1005_s25 = sphi %s1070_s25, %s1282_s25   ;;  %s1001_s24 = sphi %s1068_s24, %s1281_s24  }
   0xb   : > { %s769_s8 = sadd.s32 4294967294, %s1021_s29   ;;  %s38_s9 = sadd.s32 1, %s1017_s28 }
   0xc   : > { %s47_s10 = sadd.s32 1, %s1009_s26  ;;  %p40_p0 = scmp.ge.s32.totalorder %s38_s9, 2 }
   0xd   : > { %p54_p1 = scmp.ne.s32.totalorder %s1009_s26, %s1005_s25  ;;  %p55_p2 = scmp.eq.s32.totalorder %s1021_s29, 0 }
   0xe   : > { %p60_p3 = scmp.ne.s32.totalorder %s1005_s25, %s1001_s24  ;;  %s1285_s9 = smov (%p40_p0, %s38_s9), 0 }
   0xf   : > { %1270 = sst [smem:[#allocation12_spill]] %s1285_s9  ;;  %p1109_p4 = por %p55_p2, %p54_p1 }
  0x10   : > { %p61_p5 = scmp.eq.s32.totalorder %s768_s30, 0  ;;  %s42_s12 = ssub.s32 %s1017_s28, %s1285_s9 }
  0x11   : > { %p219_p6 = scmp.eq.s32.totalorder %s768_s30, 1  ;;  %p45_p7 = scmp.eq.s32.totalorder %s42_s12, 0 }
  0x12   : > { %p1115_p8 = por %p61_p5, %p60_p3  ;;  %p225_p10 = scmp.eq.s32.totalorder %s769_s8, 1 }
  0x13   : > { %p1119_p9 = por %p219_p6, %p54_p1  ;;  %p818_p13 = scmp.lt.s32.totalorder %s1021_s29, 2 }
  0x14   : > { %s1124_s15 = scalar_select %p45_p7, %s1009_s26, %s47_s10  }
  0x15   : > { %p1126_p11 = por %p225_p10, %p60_p3  ;;  %s1133_s17 = sand.u32 1, %s1009_s26  }
  0x16   : > { %s772_s18 = sshll.u32 %s1133_s17, 3  ;;  %s798_s19 = sshll.u32 %s1017_s28, 7 }
  0x17   : > { %s1275_s0 = sld [smem:[#allocation13_spill]]  ;;  %s264_s23 = scalar_lea.vmem [#allocation2], %s772_s18 }
  0x18   : > { %s274_s30 = sshll.u32 %s264_s23, 4  ;;  %p1142_p0 = pnand %p818_p13, %p1109_p4  ;;  %s275_s30 = int_to_ptr.vmem [resolvable:$true] %s274_s30 }
  0x19   : > { %p778_p1 = scmp.ge.s32.totalorder %s1021_s29, 1  ;;  %p300_p2 = scmp.lt.s32.totalorder %s1021_s29, 3 }
  0x1a   : > { %s261_s10 = scalar_lea.sflag [#allocation3], %s1133_s17  ;;  %p883_p3 = pneg %p1142_p0 }
  0x1b   : > { %s894_s12 = scalar_lea.vmem %s275_s30, 128  ;;  %s1023_s20 = smov [#allocation2]  }
  0x1c   : > { %p895_p5 = scmp.ne.s32.totalorder %s275_s30, %s894_s12  ;;  %s899_s21 = sshll.u32 %s1023_s20, 4  ;;  %s900_s21 = int_to_ptr.vmem [resolvable:$false] %s899_s21 }
  0x1d   : > { %s272_s22 = scalar_lea.hbm %s1275_s0, %s798_s19  ;;  %s901_s11 = scalar_lea.vmem %s900_s21, 256 }
  0x1e   : > { %p897_p6 = pnand %p895_p5, %p883_p3  ;;  %p902_p4 = scmp.lt.s32.totalorder %s275_s30, %s900_s21 }
  0x1f   : > { %p903_p10 = scmp.lt.s32.totalorder %s901_s11, %s894_s12 }
  0x20   : > { %p898_p7 = pneg %p897_p6 }
  0x21   : > { %p904_p13 = por %p903_p10, %p902_p4 }
  0x23   : > { %p905_p12 = pnand %p904_p13, %p898_p7 }
  0x25   : > { %908 = shalt.err (!%p905_p12)
}
  0x26   : > { %810 = dma.hbm_to_vmem [thread:$0]  (!%p1142_p0), %s272_s22, 128, %s275_s30, %s261_s10  }
  0x27   : > { %p1160_p5 = pnand %p778_p1, %p300_p2  ;;  %s293_s12 = scalar_lea.hbm %s1259_s1, %s798_s19 }
  0x28   : > { %s285_s21 = scalar_lea.vmem [#allocation5], %s772_s18  ;;  %s282_s9 = scalar_lea.sflag [#allocation6], %s1133_s17 }
  0x29   : > { %s295_s11 = sshll.u32 %s285_s21, 4  ;;  %s1024_s22 = smov [#allocation5]   ;;  %s296_s11 = int_to_ptr.vmem [resolvable:$true] %s295_s11 }
  0x2a   : > { %s922_s28 = scalar_lea.vmem %s296_s11, 128  ;;  %s927_s30 = sshll.u32 %s1024_s22, 4  ;;  %s928_s30 = int_to_ptr.vmem [resolvable:$false] %s927_s30 }
  0x2b   : > { %p923_p12 = scmp.ne.s32.totalorder %s296_s11, %s922_s28  ;;  %s929_s10 = scalar_lea.vmem %s928_s30, 256 }
  0x2c   : > { %p930_p1 = scmp.lt.s32.totalorder %s296_s11, %s928_s30  ;;  %p931_p2 = scmp.lt.s32.totalorder %s929_s10, %s922_s28 }
  0x2d   : > { %p925_p6 = pnand %p923_p12, %p883_p3 }
  0x2e   : > { %p932_p4 = por %p931_p2, %p930_p1 }
  0x2f   : > { %p926_p7 = pneg %p925_p6 }
  0x31   : > { %p933_p10 = pnand %p932_p4, %p926_p7 }
  0x33   : > { %936 = shalt.err (!%p933_p10)
}
  0x34   : > { %813 = dma.hbm_to_vmem [thread:$0]  (!%p1142_p0), %s293_s12, 128, %s296_s11, %s282_s9  }
  0x35   : > { %304 = sbr.rel (%p1160_p5) target bundleno = 516 (0x204), region = 48  ;;  %s1176_s0 = sand.u32 (!%p1160_p5), 1, %s1005_s25  }
  0x36   : > { %s1179_s17 = sshll.u32 (!%p1160_p5), %s1176_s0, 3  ;;  %s307_s18 = scalar_lea.sflag (!%p1160_p5), [#allocation3], %s1176_s0 }
  0x37   : > { %s310_s28 = scalar_lea.vmem (!%p1160_p5), [#allocation2], %s1179_s17 }
  0x3a   : > { %988 = dma.done.wait (%p1115_p8), %s307_s18, 128  }
  0x3b   : > { %990 = vsyncadd (%p1115_p8), %s307_s18, 4294967168  ;;  %s316_s9 = scalar_lea.sflag [#allocation6], %s1176_s0  ;;  %s319_s19 = scalar_lea.vmem [#allocation5], %s1179_s17 }
  0x3c   : > { %992 = dma.done.wait (%p1115_p8), %s316_s9, 128  }
  0x3d   : > { %994 = vsyncadd (%p1115_p8), %s316_s9, 4294967168  ;;  %v1025_v0 = vmov 0.0   ;;  %v1026_v1 = vmov 0   ;;  %v359_v2 = vld [vmem:[%s319_s19] sm:$0xff]  ;;  %vm368_vm0 = vcmask 1043456   ;;  %v358_v3 = vld [vmem:[%s310_s28] sm:$0xff] }
  0x3e   : > { %437 = vmatprep.mubr.f32.mxu0 %v1025_v0  ;;  %517 = vmatprep.mubr.f32.mxu1 %v1025_v0  ;;  %v363_v4 = vcombine.high %v359_v2, %v359_v2  ;;  %v445_v5 = vcombine.high %v358_v3, %v358_v3  ;;  %v524_v6 = vld [vmem:[%s1263_s5] sm:$0xf]  ;;  %vm364_vm1 = vcmask 31744   ;;  %s800_s18 = sshll.u32 %s1013_s27, 7  ;;  %s354_s28 = scalar_lea.vmem [#allocation7], %s1179_s17 }
  0x3f   : > { %870 = vset.pattern.permute.xlu0 %v1026_v1  ;;  %v361_v7 = vld [vmem:[%s1261_s3] sm:$0xf]  ;;  %s658_s9 = sshll.u32 %s354_s28, 4  ;;  %s656_s23 = scalar_lea.hbm %s1265_s7, %s800_s18  ;;  %s659_s9 = int_to_ptr.vmem [resolvable:$true] %s658_s9 }
  0x40   : > { %v360_v8 = vld [vmem:[%s1260_s2] sm:$0xf]  ;;  %527 = vperm.xlu0 %870, %v524_v6   ;;  %782 = vmatprep.subr.msk.mxu0 %vm368_vm0, %v363_v4  ;;  %s642_s20 = scalar_lea.sflag [#allocation4], %s1176_s0  ;;  %s937_s12 = scalar_lea.vmem %s659_s9, 128 }
  0x41   : > { %785 = vmatprep.subr.msk.mxu1 %vm368_vm0, %v445_v5  ;;  %v535_v9 = vld [vmem:[%s1264_s6] sm:$0xf]  ;;  %783 = vmatpush1.msk.msra.mxu0 %vm368_vm0, %v359_v2  ;;  %p938_p8 = scmp.ne.s32.totalorder %s659_s9, %s937_s12  ;;  %s1027_s13 = smov [#allocation7]  }
  0x42   : > { %786 = vmatpush1.msk.msra.mxu1 %vm368_vm0, %v358_v3  ;;  %784 = vmatmul.mubr.msk.f32.vlgmr.msra.gmra.mxu0 %vm364_vm1, %v361_v7  ;;  %v534_v21 = vld [vmem:[%s1262_s4] sm:$0xf]  ;;  %s941_s21 = sshll.u32 %s1027_s13, 4  ;;  %s942_s21 = int_to_ptr.vmem [resolvable:$false] %s941_s21 }
  0x43   : > { %787 = vmatmul.mubr.msk.f32.vlgmr.msra.gmra.mxu1 %vm364_vm1, %v360_v8  ;;  %614 = vmatprep.mubr.f32.mxu0 %v1025_v0  ;;  %p939_p0 = pnand %p938_p8, %p1119_p9  ;;  %s943_s27 = scalar_lea.vmem %s942_s21, 256 }
  0x44   : > { %538 = vperm.xlu0 %870, %v535_v9   ;;  %p944_p13 = scmp.lt.s32.totalorder %s659_s9, %s942_s21  ;;  %p945_p5 = scmp.lt.s32.totalorder %s943_s27, %s937_s12 }
  0x45   : > { %p940_p3 = pneg %p939_p0 }
  0x46   : > { %p946_p12 = por %p945_p5, %p944_p13 }
  0x48   : > { %p947_p6 = pnand %p946_p12, %p940_p3 }
  0xbb   : > { %v528_v15 = vpop.permute.xlu0 %527 }
  0xbf   : > { %v539_v22 = vpop.permute.xlu0 %538 }
 0x102   : > { %v439_v10 = vpop.f32.mrf.mxu0 }
 0x103   : > { %v519_v11 = vpop.f32.mrf.mxu1 }
 0x104   : > { %v520_v12 = vadd.f32 %v519_v11, %v439_v10  ;;  %v441_v13 = vpop.f32.mrf.mxu0 }
 0x105   : > { %v521_v14 = vpop.f32.mrf.mxu1 }
 0x106   : > { %v522_v16 = vadd.f32 %v521_v14, %v441_v13  ;;  %v530_v17 = vadd.f32 %v528_v15, %v520_v12 }
 0x108   : > { %v531_v18 = vadd.f32 %v528_v15, %v522_v16  ;;  %v532_v20 = vmax.f32 %v530_v17, 0.0 }
 0x10a   : > { %v533_v19 = vmax.f32 %v531_v18, 0.0 }
 0x10c   : > { %788 = vmatprep.subr.msk.mxu0 %vm368_vm0, %v533_v19 }
 0x10d   : > { %789 = vmatpush1.msk.msra.mxu0 %vm368_vm0, %v532_v20 }
 0x10e   : > { %790 = vmatmul.mubr.msk.f32.vlgmr.msra.gmra.mxu0 %vm364_vm1, %v534_v21 }
 0x1ce   : > { %v616_v23 = vpop.f32.mrf.mxu0 }
 0x1cf   : > { %v617_v24 = vadd.f32 %v616_v23, %v539_v22 }
 0x1d0   : > { %v618_v25 = vpop.f32.mrf.mxu0 }
 0x1d1   : > { %v791_v26 = vmul.f32 -1.442695, %v617_v24  ;;  %v619_v27 = vadd.f32 %v618_v25, %v539_v22 }
 0x1d3   : > { %873 = vpow2.f32 %v791_v26  ;;  %v792_v28 = vmul.f32 -1.442695, %v619_v27 }
 0x1d5   : > { %875 = vpow2.f32 %v792_v28 }
 0x1e0   : > { %v874_v29 = vpop.eup %873 }
 0x1e1   : > { %v627_v30 = vadd.f32 1.0, %v874_v29 }
 0x1e2   : > { %v876_v31 = vpop.eup %875 }
 0x1e3   : > { %877 = vrcp.f32 %v627_v30  ;;  %v628_v32 = vadd.f32 1.0, %v876_v31 }
 0x1e5   : > { %879 = vrcp.f32 %v628_v32 }
 0x1f0   : > { %v878_v33 = vpop.eup %877 }
 0x1f1   : > { %v634_v35 = vmul.f32 %v878_v33, %v359_v2 }
 0x1f2   : > { %v880_v34 = vpop.eup %879 }
 0x1f3   : > { %v635_v36 = vmul.f32 %v880_v34, %v363_v4 }
 0x1f5   : > { %v638_v37 = vcombine.low %v634_v35, %v635_v36 }
 0x1f7   : > { %640 = vst [vmem:[%s354_s28] sm:$0xff] %v638_v37 }
 0x1f8   : > { %950 = shalt.err (!%p947_p6)
}
 0x1f9   : > { %s951_s17 = scalar_lea.hbm %s656_s23, 128  ;;  %s955_s22 = scalar_lea.hbm %s1265_s7, 256 }
 0x1fa   : > { %p952_p7 = scmp.ne.s32.totalorder %s656_s23, %s951_s17  ;;  %p956_p4 = scmp.lt.s32.totalorder %s656_s23, %s1265_s7 }
 0x1fb   : > { %p957_p10 = scmp.lt.s32.totalorder %s955_s22, %s951_s17 }
 0x1fc   : > { %p953_p1 = pnand %p952_p7, %p1119_p9 }
 0x1fd   : > { %p958_p8 = por %p957_p10, %p956_p4 }
 0x1fe   : > { %p954_p2 = pneg %p953_p1 }
 0x200   : > { %p959_p0 = pnand %p958_p8, %p954_p2 }
 0x202   : > { %962 = shalt.err (!%p959_p0)
}
 0x203   : > { %805 = dma.vmem_to_hbm [thread:$0]  (%p1119_p9), %s659_s9, 128, %s656_s23, %s642_s20  }
 0x204 PF: > { %s670_s18 = sand.u32 1, %s1001_s24   ;;  %p1278_p3 = scmp.ge.s32.totalorder %s1021_s29, 2 }
 0x205   : > { %s671_s28 = scalar_lea.sflag [#allocation4], %s670_s18 }
 0x206   : > { %p815_p13 = pnand %p1278_p3, %p1126_p11 }
 0x208   : > { %p816_p5 = pneg %p815_p13 }
 0x20a   : > { %996 = dma.done.wait (%p816_p5), %s671_s28, 128  }
 0x20b   : > { %998 = vsyncadd (%p816_p5), %s671_s28, 4294967168  ;;  %s26_s29 = sadd.s32 1, %s1021_s29   ;;  %s1279_s27 = sld [smem:[#allocation11_spill]] }
 0x20c   : > { %p23_p12 = scmp.ge.s32.totalorder %s26_s29, 4   ;;  %s1280_s28 = sld [smem:[#allocation12_spill]] }
 0x20d   : > { %s1281_s24 = smov %s1005_s25  ;;  %s1282_s25 = smov %s1009_s26 }
 0x20e   : > { %s1283_s26 = smov %s1124_s15  ;;  %25 = sbr.rel (!%p23_p12) target bundleno = 10 (0xa), region = 106 }
 0x213   :  { %676 = vsyncpa [#allocation3], 1 }
 0x214   :  { %678 = vsyncpa [#allocation3 + $0x1], 1 }
 0x215   :  { %679 = vsyncpa [#allocation6], 1 }
 0x216   :  { %681 = vsyncpa [#allocation6 + $0x1], 1 }
 0x217   :  { %682 = vsyncpa [#allocation4], 1 }
 0x218   :  { %684 = vsyncpa [#allocation4 + $0x1], 1 }

</bundles_post_ra>
